<compile_context>
chip_gen: v6e
topology: v6e:2x2x1
jax: 0.10.0
libtpu: 0.0.40
codegen_flags: <defaults>
</compile_context>

<pallas_src>
import functools

import jax
import jax.numpy as jnp
import numpy as np
from jax.experimental import pallas as pl
from jax.experimental.pallas import tpu as pltpu

WEIGHT_REGULARIZER = 1e-6
DROPOUT_REGULARIZER = 1e-5
EPS = 1e-7
TEMP = 0.1

_LANE = 128
_SUBLANE = 8


def _round_up(x, m):
    return ((x + m - 1) // m) * m


def _concrete_dropout_linear_kernel(plogit_ref, x_ref, u_ref, w_ref, b_ref,
                                    out_ref, reg_ref, *, input_dim):
    # p = sigmoid(p_logit) kept as a (1, 1) f32 vector so the "scalar" math
    # stays on the VPU/EUP (no SMEM round-trip).
    p = jax.nn.sigmoid(plogit_ref[...])                       # (1, 1)
    retain = 1.0 - p                                          # (1, 1)
    inv_retain = 1.0 / retain                                 # (1, 1), hoisted
    logit_p = jnp.log(p + EPS) - jnp.log(1.0 - p + EPS)       # (1, 1), cheap

    # ---- concrete dropout mask (uniform noise streamed in as an input) ----
    u = u_ref[...]                                            # (TB, Din_p) f32
    # one log per element: log(u+eps) - log(1-u+eps) == log((u+eps)/(1-u+eps))
    noise_logit = jnp.log((u + EPS) / (1.0 - u + EPS))
    # retain mask = 1 - sigmoid(z) = sigmoid(-z): saves a per-element subtract.
    retain_mask = jax.nn.sigmoid((logit_p + noise_logit) * (-1.0 / TEMP))
    scale = retain_mask * inv_retain                          # (TB, Din_p)
    x_d = x_ref[...].astype(jnp.float32) * scale

    # ---- wrapped layer: Linear (MXU matmul + bias, f32 accumulate) ----
    y = jnp.dot(x_d.astype(w_ref.dtype), w_ref[...],
                preferred_element_type=jnp.float32)
    y = y + b_ref[...].astype(jnp.float32)
    out_ref[...] = y.astype(out_ref.dtype)

    # ---- regularization: computed exactly once (first grid step) ----
    @pl.when(pl.program_id(0) == 0)
    def _():
        w = w_ref[...].astype(jnp.float32)
        bb = b_ref[...].astype(jnp.float32)
        sum_sq = jnp.sum(w * w) + jnp.sum(bb * bb)            # scalar
        weights_reg = (WEIGHT_REGULARIZER * sum_sq) * inv_retain
        dropout_reg = p * jnp.log(p) + (1.0 - p) * jnp.log(1.0 - p)
        dropout_reg = dropout_reg * (DROPOUT_REGULARIZER * input_dim)
        reg_ref[...] = (weights_reg + dropout_reg).astype(reg_ref.dtype)


def concrete_dropout_linear(x, p_logit, w, b, noise_key):
    """Fused ConcreteDropout + Linear.

    x: (B, D_in), p_logit: (1,), w: (D_in, D_out) (transposed vs PyTorch),
    b: (D_out,).  Returns (out (B, D_out), regularization (1,)).
    """
    B, D_in = x.shape
    assert w.shape[0] == D_in
    D_out = w.shape[1]

    din_p = _round_up(D_in, _LANE)
    dout_p = _round_up(D_out, _LANE)

    # Largest batch tile whose (double-buffered) footprint fits a v7x-safe
    # budget; W + bias stay resident across the whole grid.
    def footprint(tb):
        return 4 * (din_p * dout_p + dout_p        # resident W + bias
                    + 2 * 2 * tb * din_p           # x + noise, double-buffered
                    + 2 * tb * dout_p)             # out, double-buffered

    budget = 40 * 1024 * 1024
    tb = _SUBLANE
    for cand in (512, 256, 128, 64, 32, 16, 8):
        if cand <= _round_up(B, _SUBLANE) and footprint(cand) <= budget:
            tb = cand
            break
    # TODO(synk): for very large D_in*D_out (resident W > ~32 MiB) a K-axis
    # grid with an f32 accumulator scratch would be needed; not required here.

    b_pad_rows = _round_up(B, tb)
    grid = (b_pad_rows // tb,)

    # Zero padding: zero rows/cols of W/b contribute nothing to the matmul or
    # to sum-of-squares; padded batch rows/cols are sliced off below.
    x_pad = jnp.zeros((b_pad_rows, din_p), x.dtype).at[:B, :D_in].set(x)
    w_pad = jnp.zeros((din_p, dout_p), w.dtype).at[:D_in, :D_out].set(w)
    bias_pad = jnp.zeros((1, dout_p), jnp.float32).at[0, :D_out].set(
        b.astype(jnp.float32))

    # torch.rand_like -> U[0,1) noise generated host-side; each batch tile gets
    # distinct draws by construction.  (Stream differs from torch's RNG.)
    unif = jax.random.uniform(noise_key, (B, D_in), jnp.float32)
    unif_pad = jnp.full((b_pad_rows, din_p), 0.5,
                        jnp.float32).at[:B, :D_in].set(unif)
    plogit2 = p_logit.reshape(1, 1).astype(jnp.float32)

    kernel = functools.partial(_concrete_dropout_linear_kernel,
                               input_dim=D_in)

    cost = pl.CostEstimate(
        flops=2 * b_pad_rows * din_p * dout_p + 10 * b_pad_rows * din_p,
        transcendentals=2 * b_pad_rows * din_p,   # one log + one exp / element
        bytes_accessed=4 * (2 * b_pad_rows * din_p + din_p * dout_p
                            + dout_p + b_pad_rows * dout_p),
    )

    out, reg = pl.pallas_call(
        kernel,
        grid=grid,
        in_specs=[
            pl.BlockSpec((1, 1), lambda i: (0, 0)),            # p_logit
            pl.BlockSpec((tb, din_p), lambda i: (i, 0)),       # x tile
            pl.BlockSpec((tb, din_p), lambda i: (i, 0)),       # uniform noise
            pl.BlockSpec((din_p, dout_p), lambda i: (0, 0)),   # W (resident)
            pl.BlockSpec((1, dout_p), lambda i: (0, 0)),       # bias (resident)
        ],
        out_specs=(
            pl.BlockSpec((tb, dout_p), lambda i: (i, 0)),      # out tile
            pl.BlockSpec((1, 1), lambda i: (0, 0)),            # regularization
        ),
        out_shape=(
            jax.ShapeDtypeStruct((b_pad_rows, dout_p), x.dtype),
            jax.ShapeDtypeStruct((1, 1), jnp.float32),
        ),
        compiler_params=pltpu.CompilerParams(
            dimension_semantics=("arbitrary",),
            vmem_limit_bytes=int(min(max(footprint(tb) + (2 << 20),
                                         16 * 1024 * 1024),
                                     48 * 1024 * 1024)),
        ),
        cost_estimate=cost,
    )(plogit2, x_pad, unif_pad, w_pad, bias_pad)

    # PyTorch returns regularization with shape (1,) (same as p_logit).
    return out[:B, :D_out], reg.reshape(1)


def _reference(x, p_logit, w, b, unif):
    """Pure-JAX reference mirroring the PyTorch forward (same noise draws)."""
    p = jax.nn.sigmoid(p_logit.reshape(()))
    drop_logit = (jnp.log(p + EPS) - jnp.log(1.0 - p + EPS)
                  + jnp.log(unif + EPS) - jnp.log(1.0 - unif + EPS))
    drop_prob = jax.nn.sigmoid(drop_logit / TEMP)
    x_d = x * (1.0 - drop_prob) / (1.0 - p)
    out = x_d @ w + b
    sum_sq = jnp.sum(w ** 2) + jnp.sum(b ** 2)
    reg = (WEIGHT_REGULARIZER * sum_sq / (1.0 - p)
           + (p * jnp.log(p) + (1.0 - p) * jnp.log(1.0 - p))
           * (DROPOUT_REGULARIZER * x.shape[1]))
    return out, reg.reshape(1)


if __name__ == "__main__":
    B, D_in, D_out = 8, 32, 64

    key = jax.random.PRNGKey(0)
    kx, kw, kb, kn = jax.random.split(key, 4)

    x = jax.random.normal(kx, (B, D_in), dtype=jnp.float32)
    # p_logit: init_min == init_max == 0.2  =>  logit(0.2)  (deterministic)
    p_logit = jnp.asarray([np.log(0.2) - np.log(0.8)], dtype=jnp.float32)
    # Linear layer params stored as (D_in, D_out), transposed vs PyTorch.
    bound = 1.0 / np.sqrt(D_in)
    w = jax.random.uniform(kw, (D_in, D_out), jnp.float32, -bound, bound)
    b = jax.random.uniform(kb, (D_out,), jnp.float32, -bound, bound)

    out, reg = concrete_dropout_linear(x, p_logit, w, b, kn)
    jax.block_until_ready((out, reg))

    assert out.shape == (B, D_out) and reg.shape == (1,)
    assert bool(jnp.all(jnp.isfinite(out))) and bool(jnp.all(jnp.isfinite(reg)))

    # Cross-check against the pure-JAX reference using the same noise draws.
    unif_same = jax.random.uniform(kn, (B, D_in), jnp.float32)
    ref_out, ref_reg = _reference(x, p_logit, w, b, unif_same)
    np.testing.assert_allclose(np.asarray(out), np.asarray(ref_out),
                               rtol=5e-3, atol=5e-4)
    np.testing.assert_allclose(np.asarray(reg), np.asarray(ref_reg),
                               rtol=5e-3, atol=5e-6)

    print("KERNEL_OK")
</pallas_src>

<mosaic_0001>
module attributes {stable_mosaic.version = 11 : i64} {
  func.func @_concrete_dropout_linear_kernel(%arg0: i32, %arg1: memref<1x1xf32, #tpu.memory_space<vmem>>, %arg2: memref<8x128xf32, #tpu.memory_space<vmem>>, %arg3: memref<8x128xf32, #tpu.memory_space<vmem>>, %arg4: memref<128x128xf32, #tpu.memory_space<vmem>>, %arg5: memref<1x128xf32, #tpu.memory_space<vmem>>, %arg6: memref<8x128xf32, #tpu.memory_space<vmem>>, %arg7: memref<1x1xf32, #tpu.memory_space<vmem>>) attributes {dimension_semantics = [#tpu.dimension_semantics<arbitrary>], iteration_bounds = array<i64: 1>, scalar_prefetch = 0 : i64, scratch_operands = 0 : i64, tpu.core_type = #tpu.core_type<tc>, window_params = [{pipeline_mode = #tpu.pipeline_mode<synchronous>, transform_indices = @transform_0, window_bounds = array<i64: 1, 1>}, {transform_indices = @transform_1, window_bounds = array<i64: 8, 128>}, {transform_indices = @transform_2, window_bounds = array<i64: 8, 128>}, {pipeline_mode = #tpu.pipeline_mode<synchronous>, transform_indices = @transform_3, window_bounds = array<i64: 128, 128>}, {pipeline_mode = #tpu.pipeline_mode<synchronous>, transform_indices = @transform_4, window_bounds = array<i64: 1, 128>}, {transform_indices = @transform_5, window_bounds = array<i64: 8, 128>}, {pipeline_mode = #tpu.pipeline_mode<synchronous>, transform_indices = @transform_6, window_bounds = array<i64: 1, 1>}]} {
    %c0 = arith.constant 0 : index
    %c0_0 = arith.constant 0 : index
    %0 = vector.load %arg1[%c0, %c0_0] : memref<1x1xf32, #tpu.memory_space<vmem>>, vector<1x1xf32>
    %1 = arith.negf %0 : vector<1x1xf32>
    %2 = math.exp %1 : vector<1x1xf32>
    %cst = arith.constant 1.000000e+00 : f32
    %3 = vector.broadcast %cst : f32 to vector<1x1xf32>
    %4 = arith.addf %3, %2 : vector<1x1xf32>
    %5 = arith.divf %3, %4 : vector<1x1xf32>
    %cst_1 = arith.constant 1.000000e+00 : f32
    %6 = vector.broadcast %cst_1 : f32 to vector<1x1xf32>
    %7 = arith.subf %6, %5 : vector<1x1xf32>
    %cst_2 = arith.constant 1.000000e+00 : f32
    %8 = vector.broadcast %cst_2 : f32 to vector<1x1xf32>
    %9 = arith.divf %8, %7 : vector<1x1xf32>
    %cst_3 = arith.constant 1.000000e-07 : f32
    %10 = vector.broadcast %cst_3 : f32 to vector<1x1xf32>
    %11 = arith.addf %5, %10 : vector<1x1xf32>
    %12 = math.log %11 : vector<1x1xf32>
    %cst_4 = arith.constant 1.000000e+00 : f32
    %13 = vector.broadcast %cst_4 : f32 to vector<1x1xf32>
    %14 = arith.subf %13, %5 : vector<1x1xf32>
    %cst_5 = arith.constant 1.000000e-07 : f32
    %15 = vector.broadcast %cst_5 : f32 to vector<1x1xf32>
    %16 = arith.addf %14, %15 : vector<1x1xf32>
    %17 = math.log %16 : vector<1x1xf32>
    %18 = arith.subf %12, %17 : vector<1x1xf32>
    %c0_6 = arith.constant 0 : index
    %c0_7 = arith.constant 0 : index
    %19 = vector.load %arg3[%c0_6, %c0_7] : memref<8x128xf32, #tpu.memory_space<vmem>>, vector<8x128xf32>
    %cst_8 = arith.constant 1.000000e-07 : f32
    %20 = vector.broadcast %cst_8 : f32 to vector<8x128xf32>
    %21 = arith.addf %19, %20 : vector<8x128xf32>
    %cst_9 = arith.constant 1.000000e+00 : f32
    %22 = vector.broadcast %cst_9 : f32 to vector<8x128xf32>
    %23 = arith.subf %22, %19 : vector<8x128xf32>
    %cst_10 = arith.constant 1.000000e-07 : f32
    %24 = vector.broadcast %cst_10 : f32 to vector<8x128xf32>
    %25 = arith.addf %23, %24 : vector<8x128xf32>
    %26 = arith.divf %21, %25 : vector<8x128xf32>
    %27 = math.log %26 : vector<8x128xf32>
    %28 = vector.broadcast %18 : vector<1x1xf32> to vector<8x128xf32>
    %29 = arith.addf %28, %27 : vector<8x128xf32>
    %cst_11 = arith.constant -1.000000e+01 : f32
    %30 = vector.broadcast %cst_11 : f32 to vector<8x128xf32>
    %31 = arith.mulf %29, %30 : vector<8x128xf32>
    %32 = arith.negf %31 : vector<8x128xf32>
    %33 = math.exp %32 : vector<8x128xf32>
    %cst_12 = arith.constant 1.000000e+00 : f32
    %34 = vector.broadcast %cst_12 : f32 to vector<8x128xf32>
    %35 = arith.addf %34, %33 : vector<8x128xf32>
    %36 = arith.divf %34, %35 : vector<8x128xf32>
    %37 = vector.broadcast %9 : vector<1x1xf32> to vector<8x128xf32>
    %38 = arith.mulf %36, %37 : vector<8x128xf32>
    %c0_13 = arith.constant 0 : index
    %c0_14 = arith.constant 0 : index
    %39 = vector.load %arg2[%c0_13, %c0_14] : memref<8x128xf32, #tpu.memory_space<vmem>>, vector<8x128xf32>
    %40 = arith.mulf %39, %38 : vector<8x128xf32>
    %c0_15 = arith.constant 0 : index
    %c0_16 = arith.constant 0 : index
    %41 = vector.load %arg4[%c0_15, %c0_16] : memref<128x128xf32, #tpu.memory_space<vmem>>, vector<128x128xf32>
    %cst_17 = arith.constant dense<0.000000e+00> : vector<8x128xf32>
    %42 = tpu.matmul %40, %41, %cst_17 {dimension_numbers = #tpu.dot_dimension_numbers<[1], [0], [0], [1], [0, 0, 1, 1], [], []>} : vector<8x128xf32>, vector<128x128xf32>, vector<8x128xf32> -> vector<8x128xf32>
    %c0_18 = arith.constant 0 : index
    %c0_19 = arith.constant 0 : index
    %43 = vector.load %arg5[%c0_18, %c0_19] : memref<1x128xf32, #tpu.memory_space<vmem>>, vector<1x128xf32>
    %44 = vector.broadcast %43 : vector<1x128xf32> to vector<8x128xf32>
    %45 = arith.addf %42, %44 : vector<8x128xf32>
    %c0_20 = arith.constant 0 : index
    %c0_21 = arith.constant 0 : index
    %46 = vector.load %arg6[%c0_20, %c0_21] : memref<8x128xf32, #tpu.memory_space<vmem>>, vector<8x128xf32>
    tpu.vector_store %arg6[%c0_20, %c0_21], %45 {strides = array<i32>} : memref<8x128xf32, #tpu.memory_space<vmem>>, vector<8x128xf32>,
    %c0_i32 = arith.constant 0 : i32
    %47 = arith.cmpi eq, %arg0, %c0_i32 : i32
    %48 = arith.extui %47 : i1 to i32
    %c0_i32_22 = arith.constant 0 : i32
    %49 = arith.cmpi ne, %48, %c0_i32_22 : i32
    scf.if %49 {
      %c0_23 = arith.constant 0 : index
      %c0_24 = arith.constant 0 : index
      %50 = vector.load %arg4[%c0_23, %c0_24] : memref<128x128xf32, #tpu.memory_space<vmem>>, vector<128x128xf32>
      %c0_25 = arith.constant 0 : index
      %c0_26 = arith.constant 0 : index
      %51 = vector.load %arg5[%c0_25, %c0_26] : memref<1x128xf32, #tpu.memory_space<vmem>>, vector<1x128xf32>
      %52 = arith.mulf %50, %50 : vector<128x128xf32>
      %53 = vector.shape_cast %52 : vector<128x128xf32> to vector<1x128x128xf32>
      %cst_27 = arith.constant dense<0.000000e+00> : vector<1xf32>
      %54 = vector.multi_reduction <add>, %53, %cst_27 [1, 2] : vector<1x128x128xf32> to vector<1xf32>
      %55 = vector.shape_cast %54 : vector<1xf32> to vector<1x1x1xf32>
      %56 = vector.extract %55[0, 0, 0] : f32 from vector<1x1x1xf32>
      %57 = arith.mulf %51, %51 : vector<1x128xf32>
      %58 = vector.shape_cast %57 : vector<1x128xf32> to vector<1x1x128xf32>
      %cst_28 = arith.constant dense<0.000000e+00> : vector<1xf32>
      %59 = vector.multi_reduction <add>, %58, %cst_28 [1, 2] : vector<1x1x128xf32> to vector<1xf32>
      %60 = vector.shape_cast %59 : vector<1xf32> to vector<1x1x1xf32>
      %61 = vector.extract %60[0, 0, 0] : f32 from vector<1x1x1xf32>
      %62 = arith.addf %56, %61 : f32
      %cst_29 = arith.constant 9.99999997E-7 : f32
      %63 = arith.mulf %cst_29, %62 : f32
      %64 = vector.broadcast %63 : f32 to vector<1x1xf32>
      %65 = arith.mulf %64, %9 : vector<1x1xf32>
      %66 = math.log %5 : vector<1x1xf32>
      %67 = arith.mulf %5, %66 : vector<1x1xf32>
      %cst_30 = arith.constant 1.000000e+00 : f32
      %68 = vector.broadcast %cst_30 : f32 to vector<1x1xf32>
      %69 = arith.subf %68, %5 : vector<1x1xf32>
      %cst_31 = arith.constant 1.000000e+00 : f32
      %70 = vector.broadcast %cst_31 : f32 to vector<1x1xf32>
      %71 = arith.subf %70, %5 : vector<1x1xf32>
      %72 = math.log %71 : vector<1x1xf32>
      %73 = arith.mulf %69, %72 : vector<1x1xf32>
      %74 = arith.addf %67, %73 : vector<1x1xf32>
      %cst_32 = arith.constant 3.200000e-04 : f32
      %75 = vector.broadcast %cst_32 : f32 to vector<1x1xf32>
      %76 = arith.mulf %74, %75 : vector<1x1xf32>
      %77 = arith.addf %65, %76 : vector<1x1xf32>
      %c0_33 = arith.constant 0 : index
      %c0_34 = arith.constant 0 : index
      %78 = vector.load %arg7[%c0_33, %c0_34] : memref<1x1xf32, #tpu.memory_space<vmem>>, vector<1x1xf32>
      tpu.vector_store %arg7[%c0_33, %c0_34], %77 {strides = array<i32>} : memref<1x1xf32, #tpu.memory_space<vmem>>, vector<1x1xf32>,
    } else {
    }
    return
  }
  func.func @transform_0(%arg0: i32) -> (i32, i32) {
    %c0_i32 = arith.constant 0 : i32
    %c0_i32_0 = arith.constant 0 : i32
    %c0_i32_1 = arith.constant 0 : i32
    return %c0_i32, %c0_i32_0 : i32, i32
  }
  func.func @transform_1(%arg0: i32) -> (i32, i32) {
    %c0_i32 = arith.constant 0 : i32
    %c0_i32_0 = arith.constant 0 : i32
    return %arg0, %c0_i32 : i32, i32
  }
  func.func @transform_2(%arg0: i32) -> (i32, i32) {
    %c0_i32 = arith.constant 0 : i32
    %c0_i32_0 = arith.constant 0 : i32
    return %arg0, %c0_i32 : i32, i32
  }
  func.func @transform_3(%arg0: i32) -> (i32, i32) {
    %c0_i32 = arith.constant 0 : i32
    %c0_i32_0 = arith.constant 0 : i32
    %c0_i32_1 = arith.constant 0 : i32
    return %c0_i32, %c0_i32_0 : i32, i32
  }
  func.func @transform_4(%arg0: i32) -> (i32, i32) {
    %c0_i32 = arith.constant 0 : i32
    %c0_i32_0 = arith.constant 0 : i32
    %c0_i32_1 = arith.constant 0 : i32
    return %c0_i32, %c0_i32_0 : i32, i32
  }
  func.func @transform_5(%arg0: i32) -> (i32, i32) {
    %c0_i32 = arith.constant 0 : i32
    %c0_i32_0 = arith.constant 0 : i32
    return %arg0, %c0_i32 : i32, i32
  }
  func.func @transform_6(%arg0: i32) -> (i32, i32) {
    %c0_i32 = arith.constant 0 : i32
    %c0_i32_0 = arith.constant 0 : i32
    %c0_i32_1 = arith.constant 0 : i32
    return %c0_i32, %c0_i32_0 : i32, i32
  }
}

</mosaic_0001>

<bundles_post_ra>
// kernel: tpu_custom_call.1
= control target key start
LH: loop header
LB: loop body
LE: loop exit
PB: predicated region body
PF: predicated region fallthrough
CT: control target
= control target key end

     0   :  { %s654_s0 = inlined_call_operand.<no memory space> [shape: f32[1,1], index: 0, kind: input, shape index: {}]   ;;  %s655_s1 = inlined_call_operand.hbm [shape: f32[8,128], index: 1, kind: input, shape index: {}]   ;;  %s656_s2 = inlined_call_operand.hbm [shape: f32[8,128], index: 2, kind: input, shape index: {}]   ;;  %s657_s3 = inlined_call_operand.hbm [shape: f32[128,128], index: 3, kind: input, shape index: {}]   ;;  %s658_s4 = inlined_call_operand.vmem [shape: f32[1,128], index: 4, kind: input, shape index: {}]   ;;  %s659_s5 = inlined_call_operand.hbm [shape: f32[8,128], index: 5, kind: output, shape index: {0}]   ;;  %s660_s6 = inlined_call_operand.hbm [shape: f32[1,1], index: 6, kind: output, shape index: {1}]  }
   0x1   :  { %v12_v0 = vstv %s654_s0 }
   0x2   :  { %13 = vst [vmem:[#allocation2] sm:$0x1] %v12_v0 }
   0x3   :  { %14 = vsyncpa [#allocation4], 0 }
   0x4   :  { %15 = vsyncpa [#allocation7], 0 }
   0x5   :  { %16 = vsyncpa [#allocation5], 0 }
   0x6   :  { %17 = vsyncpa [#allocation11], 0  ;;  %s529_s23 = smov [#allocation6]   ;;  %s530_s25 = smov [#allocation3]  }
   0x7   :  { %s36_s24 = sshll.u32 %s529_s23, 4  ;;  %s26_s26 = sshll.u32 %s530_s25, 4  ;;  %s37_s24 = int_to_ptr.vmem [resolvable:$true] %s36_s24  ;;  %s27_s26 = int_to_ptr.vmem [resolvable:$true] %s26_s26 }
   0x8   :  { %s429_s27 = scalar_lea.vmem %s37_s24, 128  ;;  %p434_p1 = scmp.lt.s32.totalorder %s37_s24, %s37_s24 }
   0x9   :  { %p430_p0 = scmp.ne.s32.totalorder %s37_s24, %s429_s27  ;;  %p435_p2 = scmp.lt.s32.totalorder %s429_s27, %s429_s27 }
   0xb   :  { %p436_p3 = por %p435_p2, %p434_p1 }
   0xd   :  { %p437_p4 = pnand %p436_p3, %p430_p0 }
   0xf   :  { %440 = shalt.err (!%p437_p4)
}
  0x10   :  { %39 = dma.hbm_to_vmem [thread:$0]  %s656_s2, 128, %s37_s24, [#allocation7]  }
  0x11   :  { %s449_s29 = scalar_lea.vmem %s27_s26, 128  ;;  %p454_p6 = scmp.lt.s32.totalorder %s27_s26, %s27_s26 }
  0x12   :  { %p450_p5 = scmp.ne.s32.totalorder %s27_s26, %s449_s29  ;;  %p455_p7 = scmp.lt.s32.totalorder %s449_s29, %s449_s29 }
  0x14   :  { %p456_p8 = por %p455_p7, %p454_p6 }
  0x16   :  { %p457_p9 = pnand %p456_p8, %p450_p5 }
  0x18   :  { %460 = shalt.err (!%p457_p9)
}
  0x19   :  { %29 = dma.hbm_to_vmem [thread:$0]  %s655_s1, 128, %s27_s26, [#allocation4]  }
  0x1a   :  { %s531_s8 = smov [#allocation8]  }
  0x1b   :  { %s45_s9 = sshll.u32 %s531_s8, 4  ;;  %s46_s9 = int_to_ptr.vmem [resolvable:$true] %s45_s9 }
  0x1c   :  { %s469_s10 = scalar_lea.vmem %s46_s9, 2048  ;;  %p474_p11 = scmp.lt.s32.totalorder %s46_s9, %s46_s9 }
  0x1d   :  { %p470_p10 = scmp.ne.s32.totalorder %s46_s9, %s469_s10  ;;  %p475_p12 = scmp.lt.s32.totalorder %s469_s10, %s469_s10 }
  0x1f   :  { %p476_p13 = por %p475_p12, %p474_p11 }
  0x21   :  { %p477_p0 = pnand %p476_p13, %p470_p10 }
  0x23   :  { %480 = shalt.err (!%p477_p0)
}
  0x24   :  { %s532_s2 = smov 128   ;;  %s533_s11 = smov 8  }
  0x25   :  { %51 = dma.hbm_to_vmem [thread:$0]  %s657_s3, 2048, %s46_s9, [#allocation7], %s532_s2, %s532_s2, %s533_s11  }
  0x26   :  { %521 = dma.done.wait [#allocation4], 128  }
  0x27   :  { %522 = vsyncadd [#allocation4], 4294967168 }
  0x28   :  { %523 = dma.done.wait [#allocation7], 2176  }
  0x29   :  { %524 = vsyncadd [#allocation7], 4294965120  ;;  %v534_v1 = vmov 0   ;;  %v63_v2 = vld [vmem:[#allocation2] sm:$0x1]  ;;  %v588_v7 = vld [vmem:[#allocation8] sm:$0xff]  ;;  %v89_v27 = vlaneseq }
  0x2a   :  { %398 = vset.pattern.permute.xlu0 %v534_v1  ;;  %v329_v3 = vmul.f32 -1.442695, %v63_v2  ;;  %v590_v8 = vld [vmem:[#allocation8 + $0x8] sm:$0xff]  ;;  %v232_v11 = vmul.f32 %v588_v7, %v588_v7  ;;  %v600_v13 = vld [vmem:[#allocation8 + $0x10] sm:$0xff]  ;;  %v605_v16 = vld [vmem:[#allocation8 + $0x18] sm:$0xff]  ;;  %v535_v1 = vmov 0.0  }
  0x2b   :  { %v233_v12 = vmul.f32 %v590_v8, %v590_v8  ;;  %v234_v15 = vmul.f32 %v600_v13, %v600_v13  ;;  %v235_v18 = vmul.f32 %v605_v16, %v605_v16  ;;  %v609_v19 = vld [vmem:[#allocation8 + $0x20] sm:$0xff]  ;;  %v613_v22 = vld [vmem:[#allocation8 + $0x28] sm:$0xff]  ;;  %v618_v25 = vld [vmem:[#allocation8 + $0x30] sm:$0xff]  ;;  %v90_v34 = vshrl.u32 %v89_v27, 7  ;;  %349 = vmatprep.subr.mxu0 %v535_v1  ;;  %s537_s18 = smov [#allocation10]  }
  0x2c   :  { %399 = vpow2.f32 %v329_v3  ;;  %v236_v21 = vmul.f32 %v609_v19, %v609_v19  ;;  %v237_v24 = vmul.f32 %v613_v22, %v613_v22  ;;  %v238_v28 = vmul.f32 %v618_v25, %v618_v25  ;;  %v622_v29 = vld [vmem:[#allocation8 + $0x38] sm:$0xff]  ;;  %v223_v32 = vld [vmem:[#allocation8 + $0x40] sm:$0xff]  ;;  %v224_v37 = vld [vmem:[#allocation8 + $0x48] sm:$0xff]  ;;  %s315_s19 = sshll.u32 %s537_s18, 4  ;;  %s316_s19 = int_to_ptr.vmem [resolvable:$true] %s315_s19 }
  0x2d   :  { %v248_v17 = vadd.f32 %v233_v12, %v232_v11  ;;  %v239_v31 = vmul.f32 %v622_v29, %v622_v29  ;;  %v240_v35 = vmul.f32 %v223_v32, %v223_v32  ;;  %v241_v40 = vmul.f32 %v224_v37, %v224_v37  ;;  %v225_v42 = vld [vmem:[#allocation8 + $0x50] sm:$0xff]  ;;  %v226_v47 = vld [vmem:[#allocation8 + $0x58] sm:$0xff]  ;;  %v227_v52 = vld [vmem:[#allocation8 + $0x60] sm:$0xff]  ;;  %s481_s20 = scalar_lea.vmem %s316_s19, 16  ;;  %s485_s21 = scalar_lea.vmem %s316_s19, 32 }
  0x2e   :  { %v91_v45 = vsub.s32 0, %v90_v34  ;;  %v242_v46 = vmul.f32 %v225_v42, %v225_v42  ;;  %v243_v50 = vmul.f32 %v226_v47, %v226_v47  ;;  %v244_v55 = vmul.f32 %v227_v52, %v227_v52  ;;  %v228_v56 = vld [vmem:[#allocation8 + $0x68] sm:$0xff]  ;;  %v131_v60 = vld [vmem:[#allocation8 + $0x70] sm:$0xff]  ;;  %v132_v63 = vld [vmem:[#allocation8 + $0x78] sm:$0xff]  ;;  %p482_p1 = scmp.ne.s32.totalorder %s316_s19, %s481_s20  ;;  %p486_p2 = scmp.lt.s32.totalorder %s316_s19, %s316_s19 }
  0x2f   :  { %v249_v20 = vadd.f32 %v248_v17, %v234_v15  ;;  %v245_v59 = vmul.f32 %v228_v56, %v228_v56  ;;  %v246_v62 = vmul.f32 %v131_v60, %v131_v60  ;;  %v247_v2 = vmul.f32 %v132_v63, %v132_v63  ;;  %350 = vmatpush3.msra.mxu0 %v132_v63  ;;  %v80_v12 = vld [vmem:[#allocation6] sm:$0xff]  ;;  %p487_p3 = scmp.lt.s32.totalorder %s485_s21, %s481_s20 }
  0x30   :  { %351 = vmatprep.subr.mxu0 %v535_v1  ;;  %vm273_vm0 = vcmask 1040384   ;;  %vm536_vm1 = vmmov 0   ;;  %v81_v17 = vadd.f32 1e-07, %v80_v12  ;;  %vm297_vm2 = vcmask 0  }
  0x31   :  { %v250_v23 = vadd.f32 %v249_v20, %v235_v18  ;;  %352 = vmatpush3.msra.mxu0 %v131_v60  ;;  %381 = vmatprep.mubr.msk.f32.mxu0 %vm536_vm1, %v535_v1  ;;  %p488_p4 = por %p487_p3, %p486_p2 }
  0x32   :  { %353 = vmatprep.subr.mxu0 %v535_v1 }
  0x33   :  { %v251_v26 = vadd.f32 %v250_v23, %v236_v21  ;;  %354 = vmatpush3.msra.mxu0 %v228_v56  ;;  %p489_p5 = pnand %p488_p4, %p482_p1 }
  0x34   :  { %355 = vmatprep.subr.mxu0 %v535_v1 }
  0x35   :  { %v252_v30 = vadd.f32 %v251_v26, %v237_v24  ;;  %356 = vmatpush3.msra.mxu0 %v227_v52 }
  0x36   :  { %357 = vmatprep.subr.mxu0 %v535_v1 }
  0x37   :  { %v253_v33 = vadd.f32 %v252_v30, %v238_v28  ;;  %358 = vmatpush3.msra.mxu0 %v226_v47 }
  0x38   :  { %359 = vmatprep.subr.mxu0 %v535_v1 }
  0x39   :  { %v400_v4 = vpop.eup %399  ;;  %v254_v38 = vadd.f32 %v253_v33, %v239_v31  ;;  %360 = vmatpush3.msra.mxu0 %v225_v42 }
  0x3a   :  { %v67_v5 = vadd.f32 1.0, %v400_v4  ;;  %361 = vmatprep.subr.mxu0 %v535_v1 }
  0x3b   :  { %v255_v43 = vadd.f32 %v254_v38, %v240_v35  ;;  %362 = vmatpush3.msra.mxu0 %v224_v37  ;;  %v115_v37 = vld [vmem:[#allocation3] sm:$0xff] }
  0x3c   :  { %401 = vrcp.f32 %v67_v5  ;;  %v231_v5 = vld [vmem:[%s658_s4] sm:$0x1]  ;;  %363 = vmatprep.subr.mxu0 %v535_v1 }
  0x3d   :  { %v256_v48 = vadd.f32 %v255_v43, %v241_v40  ;;  %364 = vmatpush3.msra.mxu0 %v223_v32 }
  0x3e   :  { %365 = vmatprep.subr.mxu0 %v535_v1 }
  0x3f   :  { %v257_v53 = vadd.f32 %v256_v48, %v242_v46  ;;  %366 = vmatpush3.msra.mxu0 %v622_v29 }
  0x40   :  { %367 = vmatprep.subr.mxu0 %v535_v1 }
  0x41   :  { %v258_v57 = vadd.f32 %v257_v53, %v243_v50  ;;  %368 = vmatpush3.msra.mxu0 %v618_v25 }
  0x42   :  { %369 = vmatprep.subr.mxu0 %v535_v1 }
  0x43   :  { %v259_v61 = vadd.f32 %v258_v57, %v244_v55  ;;  %370 = vmatpush3.msra.mxu0 %v613_v22 }
  0x44   :  { %371 = vmatprep.subr.mxu0 %v535_v1 }
  0x45   :  { %v260_v0 = vadd.f32 %v259_v61, %v245_v59  ;;  %372 = vmatpush3.msra.mxu0 %v609_v19 }
  0x46   :  { %373 = vmatprep.subr.mxu0 %v535_v1 }
  0x47   :  { %v261_v3 = vadd.f32 %v260_v0, %v246_v62  ;;  %374 = vmatpush3.msra.mxu0 %v605_v16 }
  0x48   :  { %375 = vmatprep.subr.mxu0 %v535_v1 }
  0x49   :  { %v586_v6 = vpop.eup %401  ;;  %v262_v4 = vadd.f32 %v261_v3, %v247_v2  ;;  %376 = vmatpush3.msra.mxu0 %v600_v13 }
  0x4a   :  { %v593_v9 = vsub.f32 1.0, %v586_v6  ;;  %v73_v10 = vadd.f32 1e-07, %v586_v6  ;;  %377 = vmatprep.subr.mxu0 %v535_v1 }
  0x4b   :  { %263 = vadd.xlane.f32.xlu1 %v262_v4  ;;  %378 = vmatpush3.msra.mxu0 %v590_v8 }
  0x4c   :  { %403 = vlog2.f32 %v73_v10  ;;  %v76_v14 = vadd.f32 1e-07, %v593_v9  ;;  %v272_v10 = vmul.f32 %v231_v5, %v231_v5  ;;  %379 = vmatprep.subr.mxu0 %v535_v1 }
  0x4d   :  { %380 = vmatpush3.msra.mxu0 %v588_v7 }
  0x4e   :  { %405 = vlog2.f32 %v76_v14  ;;  %v274_v11 = vsel %vm273_vm0, %v272_v10, 0.0  ;;  %v82_v14 = vsub.f32 1.0, %v80_v12 }
  0x4f   :  { %407 = vrcp.f32 %v593_v9  ;;  %275 = vadd.xlane.f32.xlu1 %v274_v11 }
  0x50   :  { %v83_v15 = vadd.f32 1e-07, %v82_v14 }
  0x52   :  { %409 = vrcp.f32 %v83_v15 }
  0x59   :  { %v404_v36 = vpop.eup %403 }
  0x5a   :  { %v75_v39 = vmul.f32 0.6931472, %v404_v36 }
  0x5b   :  { %v406_v41 = vpop.eup %405 }
  0x5c   :  { %v78_v44 = vmul.f32 0.6931472, %v406_v41  ;;  %v626_v51 = vpop.eup %407 }
  0x5d   :  { %v109_v58 = vrot.slane %v626_v51, %v91_v45 }
  0x5e   :  { %v79_v49 = vsub.f32 %v75_v39, %v78_v44 }
  0x5f   :  { %v410_v18 = vpop.eup %409 }
  0x60   :  { %v92_v54 = vrot.slane %v79_v49, %v91_v45  ;;  %v85_v19 = vmul.f32 %v410_v18, %v81_v17 }
  0x62   :  { %94 = vperm.xlu0 %398, %v92_v54   ;;  %411 = vlog2.f32 %v85_v19 }
  0x66   :  { %111 = vperm.xlu0 %398, %v109_v58  }
  0x6f   :  { %v412_v16 = vpop.eup %411 }
  0x70   :  { %v87_v20 = vmul.f32 0.6931472, %v412_v16 }
  0xd4   :  { %v264_v7 = vpop.xlane.xlu1 %263 }
  0xd5   :  { %v265_v25 = vrot.slane %v264_v7, 4 }
  0xd7   :  { %v266_v26 = vadd.f32 %v265_v25, %v264_v7 }
  0xd8   :  { %v276_v27 = vpop.xlane.xlu1 %275 }
  0xd9   :  { %v267_v28 = vrot.slane %v266_v26, 2  ;;  %v277_v29 = vrot.slane %v276_v27, 4 }
  0xdb   :  { %v278_v30 = vadd.f32 %v277_v29, %v276_v27  ;;  %v268_v31 = vadd.f32 %v267_v28, %v266_v26 }
  0xdd   :  { %v95_v21 = vpop.permute.xlu0 %94  ;;  %v279_v32 = vrot.slane %v278_v30, 2  ;;  %v269_v33 = vrot.slane %v268_v31, 1 }
  0xde   :  { %v97_v13 = vadd.f32 %v95_v21, %v87_v20 }
  0xdf   :  { %v280_v34 = vadd.f32 %v279_v32, %v278_v30  ;;  %v270_v35 = vadd.f32 %v269_v33, %v268_v31 }
  0xe0   :  { %v330_v22 = vmul.f32 10.0, %v97_v13 }
  0xe1   :  { %v112_v38 = vpop.permute.xlu0 %111  ;;  %384 = vpush %v270_v35  ;;  %v281_v39 = vrot.slane %v280_v34, 1 }
  0xe2   :  { %v100_v23 = vmul.f32 1.442695, %v330_v22 }
  0xe3   :  { %v282_v41 = vadd.f32 %v281_v39, %v280_v34 }
  0xe4   :  { %413 = vpow2.f32 %v100_v23 }
  0xe5   :  { %386 = vpush %v282_v41 }
  0xf1   :  { %v414_v8 = vpop.eup %413 }
  0xf2   :  { %v102_v24 = vadd.f32 1.0, %v414_v8 }
  0xf4   :  { %415 = vrcp.f32 %v102_v24 }
  0xf5   :  { %417 = vlog2.f32 %v586_v6 }
  0xf6   :  { %419 = vlog2.f32 %v593_v9 }
 0x101   :  { %v416_v36 = vpop.eup %415 }
 0x102   :  { %v114_v40 = vmul.f32 %v416_v36, %v112_v38  ;;  %v418_v43 = vpop.eup %417 }
 0x103   :  { %v420_v44 = vpop.eup %419  ;;  %v289_v45 = vmul.f32 0.6931472, %v418_v43 }
 0x104   :  { %v116_v42 = vmul.f32 %v115_v37, %v114_v40  ;;  %v292_v46 = vmul.f32 0.6931472, %v420_v44 }
 0x105   :  { %v290_v47 = vmul.f32 %v586_v6, %v289_v45 }
 0x106   :  { %382 = vmatmul.mubr.f32.vlgmr.msra.gmra.mxu0 %v116_v42  ;;  %v293_v48 = vmul.f32 %v292_v46, %v593_v9 }
 0x108   :  { %v294_v49 = vadd.f32 %v293_v48, %v290_v47 }
 0x10a   :  { %v295_v50 = vmul.f32 0.00032, %v294_v49 }
 0x112   :  { %s385_s14 = spop %384 }
 0x116   :  { %s387_s15 = spop %386 }
 0x117   :  { %s284_s16 = sadd.f32 %s387_s15, %s385_s14 }
 0x119   :  { %s285_s17 = smul.f32 1e-06, %s284_s16 }
 0x11b   :  { %v286_v52 = vstv %s285_s17 }
 0x11c   :  { %v287_v53 = vmul.f32 %v626_v51, %v286_v52 }
 0x11e   :  { %v296_v54 = vadd.f32 %v295_v50, %v287_v53 }
 0x120   :  { %298 = vst.msk [vmem:[#allocation10] sm:$0x1] %vm297_vm2, %v296_v54 }
 0x121   :  { %492 = shalt.err (!%p489_p5)
}
 0x122   :  { %318 = dma.vmem_to_hbm [thread:$0]  %s316_s19, 16, %s660_s6, [#allocation11]   ;;  %v331_v6 = vld [vmem:[%s658_s4] ss:$0 sm:$0xff] }
 0x123   :  { %s538_s26 = smov [#allocation9]  }
 0x124   :  { %s305_s27 = sshll.u32 %s538_s26, 4  ;;  %s306_s27 = int_to_ptr.vmem [resolvable:$true] %s305_s27 }
 0x125   :  { %s501_s28 = scalar_lea.vmem %s306_s27, 128  ;;  %p506_p7 = scmp.lt.s32.totalorder %s306_s27, %s306_s27 }
 0x126   :  { %p502_p6 = scmp.ne.s32.totalorder %s306_s27, %s501_s28  ;;  %p507_p8 = scmp.lt.s32.totalorder %s501_s28, %s501_s28 }
 0x128   :  { %p508_p9 = por %p507_p8, %p506_p7 }
 0x12a   :  { %p509_p10 = pnand %p508_p9, %p502_p6 }
 0x1c6   :  { %v206_v9 = vpop.f32.mrf.mxu0 }
 0x1c7   :  { %v207_v51 = vadd.f32 %v331_v6, %v206_v9 }
 0x1c8   :  { %v383_v55 = vpop.f32.mrf.mxu0 }
 0x1c9   :  { %210 = vst [vmem:[#allocation9] sm:$0xff] %v207_v51 }
 0x1ca   :  { %512 = shalt.err (!%p509_p10)
}
 0x1cb   :  { %308 = dma.vmem_to_hbm [thread:$0]  %s306_s27, 128, %s659_s5, [#allocation5]  }
 0x1cc   :  { %525 = dma.done.wait [#allocation5], 128  }
 0x1cd   :  { %526 = vsyncadd [#allocation5], 4294967168 }
 0x1ce   :  { %527 = dma.done.wait [#allocation11], 16  }
 0x1cf   :  { %528 = vsyncadd [#allocation11], 4294967280 }
 0x1d0   :  { %325 = vsyncpa [#allocation4], 1 }
 0x1d1   :  { %326 = vsyncpa [#allocation7], 1 }
 0x1d2   :  { %327 = vsyncpa [#allocation5], 1 }
 0x1d3   :  { %328 = vsyncpa [#allocation11], 1 }

</bundles_post_ra>
